<compile_context>
chip_gen: v6e
topology: v6e:2x2x1
jax: 0.10.0
libtpu: 0.0.40
codegen_flags: <defaults>
</compile_context>

<pallas_src>
import functools

import jax
import jax.numpy as jnp
from jax import lax
from jax.experimental import pallas as pl
from jax.experimental.pallas import tpu as pltpu


def _shortcut_kernel(x_ref, o_ref):
    # x_ref block: (n_b, C, Hs, 2W)  -- row pairs merged on the lane axis:
    #   lanes [0, W)  = input row 2*hs   (the even row we keep)
    #   lanes [W, 2W) = input row 2*hs+1 (discarded by the selection matrix)
    # o_ref block: (n_b, C_out, Hs, Ws)
    n_b, C, Hs, W2 = x_ref.shape
    _, C_out, _, Ws = o_ref.shape
    pad = (C_out - C) // 2                      # == planes // 4 (static)

    # 0/1 selection matrix: output column j picks lane 2*j, i.e. the even
    # input row's even column.  Tiny (<= 64x16), rebuilt per step for free.
    r = lax.broadcasted_iota(jnp.int32, (W2, Ws), 0)
    c = lax.broadcasted_iota(jnp.int32, (W2, Ws), 1)
    sel = (r == 2 * c).astype(jnp.float32)

    x2 = x_ref[...].astype(jnp.float32).reshape(n_b * C * Hs, W2)
    # Exact gather-by-matmul on the MXU; HIGHEST precision keeps full f32 bits
    # (multiplying by 0/1 and accumulating in f32 reproduces x exactly).
    y2 = jnp.dot(x2, sel, precision=lax.Precision.HIGHEST,
                 preferred_element_type=jnp.float32)
    y = y2.reshape(n_b, C, Hs, Ws).astype(o_ref.dtype)

    # Single store per output element: zeros only on the two pad channel
    # slices, data once into the middle channels.
    if pad > 0:
        o_ref[:, :pad, :, :] = jnp.zeros((n_b, pad, Hs, Ws), o_ref.dtype)
        o_ref[:, pad + C:, :, :] = jnp.zeros((n_b, pad, Hs, Ws), o_ref.dtype)
    o_ref[:, pad:pad + C, :, :] = y


def _pick_batch_block(N, per_image_bytes, target_bytes=512 * 1024):
    """Largest divisor of N giving ~<=0.5 MiB input blocks and >=2 grid steps
    (so both TensorCores get work on megacore parts)."""
    best = 1
    for d in range(1, N + 1):
        if N % d != 0:
            continue
        if d * per_image_bytes > target_bytes:
            continue
        if N >= 2 and N // d < 2:
            continue
        best = max(best, d)
    return best


@functools.partial(jax.jit, static_argnums=(1,))
def lambda_shortcut(x, planes):
    """ResNet-CIFAR option-A shortcut LambdaLayer.

    x: (N, C, H, W) array (NCHW, as in PyTorch).
    Returns (N, C + 2*(planes//4), H//2, W//2), matching
    F.pad(x[:, :, ::2, ::2], (0, 0, 0, 0, planes//4, planes//4), "constant", 0).
    """
    N, C, H, W = x.shape
    assert H % 2 == 0 and W % 2 == 0, "option-A shortcut expects even H and W"
    pad = planes // 4
    C_out = C + 2 * pad
    Hs, Ws = H // 2, W // 2

    # Free reshape (no transpose, no data movement): merge each row pair onto
    # the lane axis so even-row data sits in lanes [0, W) of each block row.
    x_view = x.reshape(N, C, Hs, 2 * W)

    itemsize = jnp.dtype(x.dtype).itemsize
    n_b = _pick_batch_block(N, C * Hs * 2 * W * itemsize)

    return pl.pallas_call(
        _shortcut_kernel,
        out_shape=jax.ShapeDtypeStruct((N, C_out, Hs, Ws), x.dtype),
        grid=(N // n_b,),
        in_specs=[pl.BlockSpec((n_b, C, Hs, 2 * W), lambda i: (i, 0, 0, 0))],
        out_specs=pl.BlockSpec((n_b, C_out, Hs, Ws), lambda i: (i, 0, 0, 0)),
        compiler_params=pltpu.CompilerParams(
            dimension_semantics=("parallel",)),
    )(x_view)


if __name__ == "__main__":
    key = jax.random.PRNGKey(0)
    N, C, H, W = 2, 4, 16, 16
    planes = 2 * C                     # ResNet-CIFAR doubles planes when striding
    x = jax.random.normal(key, (N, C, H, W), dtype=jnp.float32)

    y = jax.block_until_ready(lambda_shortcut(x, planes))

    # pure-JAX reference of the torch lambda
    pad = planes // 4
    ref = jnp.pad(x[:, :, ::2, ::2], ((0, 0), (pad, pad), (0, 0), (0, 0)))

    assert y.shape == ref.shape, (y.shape, ref.shape)
    assert y.dtype == ref.dtype
    assert jnp.allclose(y, ref, rtol=1e-5, atol=1e-6), "mismatch vs reference"
    print("KERNEL_OK")
</pallas_src>

<mosaic_0001>
module attributes {stable_mosaic.version = 11 : i64} {
  func.func @_shortcut_kernel(%arg0: i32, %arg1: memref<1x4x8x32xf32, #tpu.memory_space<vmem>>, %arg2: memref<1x8x8x8xf32, #tpu.memory_space<vmem>>) attributes {dimension_semantics = [#tpu.dimension_semantics<parallel>], iteration_bounds = array<i64: 2>, scalar_prefetch = 0 : i64, scratch_operands = 0 : i64, tpu.core_type = #tpu.core_type<tc>, window_params = [{transform_indices = @transform_0, window_bounds = array<i64: 1, 4, 8, 32>}, {transform_indices = @transform_1, window_bounds = array<i64: 1, 8, 8, 8>}]} {
    %0 = tpu.iota {dimensions = array<i32: 0>} : vector<32x8xi32>
    %1 = tpu.iota {dimensions = array<i32: 1>} : vector<32x8xi32>
    %c2_i32 = arith.constant 2 : i32
    %2 = vector.broadcast %c2_i32 : i32 to vector<32x8xi32>
    %3 = arith.muli %2, %1 : vector<32x8xi32>
    %4 = arith.cmpi eq, %0, %3 : vector<32x8xi32>
    %5 = arith.extui %4 : vector<32x8xi1> to vector<32x8xi32>
    %6 = arith.sitofp %5 : vector<32x8xi32> to vector<32x8xf32>
    %c0 = arith.constant 0 : index
    %c0_0 = arith.constant 0 : index
    %c0_1 = arith.constant 0 : index
    %c0_2 = arith.constant 0 : index
    %7 = vector.load %arg1[%c0, %c0_0, %c0_1, %c0_2] : memref<1x4x8x32xf32, #tpu.memory_space<vmem>>, vector<1x4x8x32xf32>
    %8 = vector.shape_cast %7 : vector<1x4x8x32xf32> to vector<32x32xf32>
    %cst = arith.constant dense<0.000000e+00> : vector<32x8xf32>
    %9 = tpu.matmul %8, %6, %cst {dimension_numbers = #tpu.dot_dimension_numbers<[1], [0], [0], [1], [0, 0, 1, 1], [], []>, precision = #tpu.contract_precision<fp32>} : vector<32x32xf32>, vector<32x8xf32>, vector<32x8xf32> -> vector<32x8xf32>
    %10 = vector.shape_cast %9 : vector<32x8xf32> to vector<1x4x8x8xf32>
    %cst_3 = arith.constant 0.000000e+00 : f32
    %11 = vector.broadcast %cst_3 : f32 to vector<1x2x8x8xf32>
    %c0_4 = arith.constant 0 : index
    %c0_5 = arith.constant 0 : index
    %c0_6 = arith.constant 0 : index
    %c0_7 = arith.constant 0 : index
    %12 = vector.load %arg2[%c0_4, %c0_5, %c0_6, %c0_7] : memref<1x8x8x8xf32, #tpu.memory_space<vmem>>, vector<1x2x8x8xf32>
    tpu.vector_store %arg2[%c0_4, %c0_5, %c0_6, %c0_7], %11 {strides = array<i32>} : memref<1x8x8x8xf32, #tpu.memory_space<vmem>>, vector<1x2x8x8xf32>,
    %cst_8 = arith.constant 0.000000e+00 : f32
    %13 = vector.broadcast %cst_8 : f32 to vector<1x2x8x8xf32>
    %c0_9 = arith.constant 0 : index
    %c6 = arith.constant 6 : index
    %c0_10 = arith.constant 0 : index
    %c0_11 = arith.constant 0 : index
    %14 = vector.load %arg2[%c0_9, %c6, %c0_10, %c0_11] : memref<1x8x8x8xf32, #tpu.memory_space<vmem>>, vector<1x2x8x8xf32>
    tpu.vector_store %arg2[%c0_9, %c6, %c0_10, %c0_11], %13 {strides = array<i32>} : memref<1x8x8x8xf32, #tpu.memory_space<vmem>>, vector<1x2x8x8xf32>,
    %c0_12 = arith.constant 0 : index
    %c2 = arith.constant 2 : index
    %c0_13 = arith.constant 0 : index
    %c0_14 = arith.constant 0 : index
    %15 = vector.load %arg2[%c0_12, %c2, %c0_13, %c0_14] : memref<1x8x8x8xf32, #tpu.memory_space<vmem>>, vector<1x4x8x8xf32>
    tpu.vector_store %arg2[%c0_12, %c2, %c0_13, %c0_14], %10 {strides = array<i32>} : memref<1x8x8x8xf32, #tpu.memory_space<vmem>>, vector<1x4x8x8xf32>,
    return
  }
  func.func @transform_0(%arg0: i32) -> (i32, i32, i32, i32) {
    %c0_i32 = arith.constant 0 : i32
    %c0_i32_0 = arith.constant 0 : i32
    %c0_i32_1 = arith.constant 0 : i32
    %c0_i32_2 = arith.constant 0 : i32
    return %arg0, %c0_i32, %c0_i32_0, %c0_i32_1 : i32, i32, i32, i32
  }
  func.func @transform_1(%arg0: i32) -> (i32, i32, i32, i32) {
    %c0_i32 = arith.constant 0 : i32
    %c0_i32_0 = arith.constant 0 : i32
    %c0_i32_1 = arith.constant 0 : i32
    %c0_i32_2 = arith.constant 0 : i32
    return %arg0, %c0_i32, %c0_i32_0, %c0_i32_1 : i32, i32, i32, i32
  }
}

</mosaic_0001>

<bundles_post_ra>
// kernel: lambda_shortcut.1
= control target key start
LH: loop header
LB: loop body
LE: loop exit
PB: predicated region body
PF: predicated region fallthrough
CT: control target
= control target key end

     0   :  { %6 = vsyncpa [#allocation3], 0  ;;  %s1441_s0 = inlined_call_operand.vmem [shape: f32[2,4,8,32], index: 0, kind: input, shape index: {}]   ;;  %s1442_s1 = inlined_call_operand.hbm [shape: f32[2,8,8,8], index: 1, kind: output, shape index: {}]  }
   0x1   :  { %8 = vsyncpa [#allocation3 + $0x1], 0  ;;  %s1141_s6 = smov 0   ;;  %s1143_s7 = smov 0  }
   0x2   :  { %s1145_s8 = smov 0   ;;  %s1147_s9 = smov 0  }
   0x3 LB: > { %s1162_s10 = sadd.s32 4294967295, %s1124_s9   ;;  %s853_s11 = sadd.s32 4294967294, %s1124_s9   ;;  %s1124_s9 = sphi %s1147_s9, %s1456_s9   ;;  %s1120_s8 = sphi %s1145_s8, %s1455_s8   ;;  %s1116_s7 = sphi %s1143_s7, %s1454_s7   ;;  %s1112_s6 = sphi %s1141_s6, %s1453_s6  }
   0x4   : > { %s1166_s12 = sadd.s32 1, %s1124_s9   ;;  %s47_s13 = sadd.s32 1, %s1120_s8 }
   0x5   : > { %s44_s14 = ssub.s32 %s1124_s9, %s1166_s12  ;;  %p57_p0 = scmp.ne.s32.totalorder %s1120_s8, %s1116_s7 }
   0x6   : > { %p45_p1 = scmp.eq.s32.totalorder %s44_s14, 0  ;;  %p58_p2 = scmp.eq.s32.totalorder %s1162_s10, 1 }
   0x7   : > { %p63_p3 = scmp.ne.s32.totalorder %s1116_s7, %s1112_s6  ;;  %p64_p4 = scmp.eq.s32.totalorder %s853_s11, 1 }
   0x8   : > { %s1177_s15 = scalar_select %p45_p1, %s1120_s8, %s47_s13  }
   0x9   : > { %p1179_p5 = por %p58_p2, %p57_p0  ;;  %p1183_p6 = por %p64_p4, %p63_p3 }
   0xa   : > { %p856_p7 = scmp.ge.s32.totalorder %s1124_s9, 1  ;;  %p90_p8 = scmp.lt.s32.totalorder %s1124_s9, 3 }
   0xc   : > { %p91_p9 = pnand %p856_p7, %p90_p8 }
   0xd   : > { %p110_p10 = scmp.lt.s32.totalorder (!%p91_p9), %s1162_s10, 1  ;;  %s107_s23 = sand.u32 (!%p91_p9), 1, %s1116_s7  }
   0xe   : > { %94 = sbr.rel (%p91_p9) target bundleno = 281 (0x119), region = 24  ;;  %s857_s24 = sshll.u32 (!%p91_p9), %s107_s23, 6 }
   0xf   : > { %s1368_s25 = scalar_lea.vmem (!%p91_p9), [#allocation2], %s857_s24  ;;  %s888_s26 = sshll.u32 (!%p91_p9), %s1162_s10, 10 }
  0x10   : > { %s791_s27 = sshll.u32 (!%p91_p9), %s1368_s25, 4  ;;  %s1391_s30 = scalar_lea.hbm (!%p91_p9), %s1442_s1, %s888_s26  ;;  %s1393_s27 = int_to_ptr.vmem [resolvable:$true] %s791_s27 }
  0x11   : > { %s1401_s2 = scalar_lea.sflag (!%p91_p9), [#allocation3], %s107_s23  ;;  %s1064_s3 = scalar_lea.vmem (!%p91_p9), %s1393_s27, 1024 }
  0x12   : > { %p1065_p11 = scmp.ne.s32.totalorder (!%p91_p9), %s1393_s27, %s1064_s3  ;;  %s1128_s4 = smov (!%p91_p9), [#allocation2]  }
  0x13   : > { %v115_v0 = vlaneseq  ;;  %s111_s18 = scalar_select %p110_p10, %s1162_s10, 1  ;;  %vm139_vm0 = vcmask 261120   ;;  %v1126_v14 = vmov 1.0   ;;  %v1127_v15 = vmov 0.0  }
  0x14   : > { %vm766_vm5 = vcmask 64512   ;;  %p1066_p12 = pnand %p1065_p11, %p1179_p5  ;;  %s1068_s5 = sshll.u32 %s1128_s4, 4  ;;  %s1069_s5 = int_to_ptr.vmem [resolvable:$false] %s1068_s5 }
  0x15   : > { %v116_v1 = vshrl.u32 %v115_v0, 7  ;;  %v121_v2 = vand.u32 127, %v115_v0  ;;  %s887_s19 = sshll.u32 %s111_s18, 5  ;;  %767 = vst.msk [vmem:[%s1368_s25] sm:$0xff] %vm766_vm5, %v1127_v15  ;;  %768 = vst.msk [vmem:[%s1368_s25 + $0x8] sm:$0xff] %vm766_vm5, %v1127_v15  ;;  %s1070_s10 = scalar_lea.vmem %s1069_s5, 2048 }
  0x16   : > { %s114_s22 = scalar_lea.vmem %s1441_s0, %s887_s19  ;;  %876 = vst.msk [vmem:[%s1368_s25 + $0x30] sm:$0xff] %vm766_vm5, %v1127_v15  ;;  %877 = vst.msk [vmem:[%s1368_s25 + $0x38] sm:$0xff] %vm766_vm5, %v1127_v15  ;;  %p1067_p13 = pneg %p1066_p12 }
  0x17   : > { %v119_v3 = vadd.s32 24, %v116_v1  ;;  %v122_v4 = vmul.u32 2, %v121_v2  ;;  %v118_v5 = vadd.s32 16, %v116_v1  ;;  %v117_v6 = vadd.s32 8, %v116_v1  ;;  %v135_v11 = vld [vmem:[%s114_s22] sm:$0xff]  ;;  %v136_v12 = vld [vmem:[%s114_s22 + $0x8] sm:$0xff]  ;;  %p1071_p0 = scmp.lt.s32.totalorder %s1393_s27, %s1069_s5  ;;  %p1072_p1 = scmp.lt.s32.totalorder %s1070_s10, %s1064_s3 }
  0x18   : > { %v137_v13 = vld [vmem:[%s114_s22 + $0x10] sm:$0xff]  ;;  %v141_v17 = vsel %vm139_vm0, %v135_v11, 0  ;;  %v144_v19 = vsel %vm139_vm0, %v136_v12, 0  ;;  %v138_v20 = vld [vmem:[%s114_s22 + $0x18] sm:$0xff] }
  0x19   : > { %vm1194_vm1 = vcmp.eq.s32.totalorder %v119_v3, %v122_v4  ;;  %vm1198_vm2 = vcmp.eq.s32.totalorder %v118_v5, %v122_v4  ;;  %vm1202_vm3 = vcmp.eq.s32.totalorder %v117_v6, %v122_v4  ;;  %vm1206_vm4 = vcmp.eq.s32.totalorder %v116_v1, %v122_v4  ;;  %p1073_p2 = por %p1072_p1, %p1071_p0 }
  0x1a   : > { %937 = vmatprep.subr.msk.mxu0 %vm1194_vm1, %v1126_v14  ;;  %v863_v16 = vsel %vm1194_vm1, 1.0, %v1127_v15  ;;  %v862_v18 = vsel %vm1198_vm2, 1.0, %v1127_v15  ;;  %v1224_v22 = vand.u32 4294901760, %v141_v17  ;;  %v1226_v24 = vand.u32 4294901760, %v144_v19 }
  0x1b   : > { %938 = vmatpush3.msk.msra.mxu0 %vm1194_vm1, %v1126_v14  ;;  %v287_v21 = vsub.f32 %v863_v16, %v863_v16  ;;  %v294_v23 = vsub.f32 %v862_v18, %v862_v18  ;;  %v861_v25 = vsel %vm1202_vm3, 1.0, %v1127_v15  ;;  %v147_v26 = vsel %vm139_vm0, %v137_v13, 0  ;;  %p1074_p3 = pnand %p1073_p2, %p1067_p13 }
  0x1c   : > { %939 = vmatprep.subr.msk.mxu0 %vm1198_vm2, %v1126_v14  ;;  %v860_v27 = vsel %vm1206_vm4, 1.0, %v1127_v15  ;;  %v150_v28 = vsel %vm139_vm0, %v138_v20, 0  ;;  %v1245_v30 = vsub.f32 %v141_v17, %v1224_v22  ;;  %v1250_v32 = vsub.f32 %v144_v19, %v1226_v24  ;;  %959 = vmatprep.mubr.f32.mxu1 %v1224_v22 }
  0x1d   : > { %940 = vmatpush3.msk.msra.mxu0 %vm1198_vm2, %v1126_v14  ;;  %v1242_v29 = vand.u32 4294901760, %v287_v21  ;;  %v1247_v31 = vand.u32 4294901760, %v294_v23  ;;  %v301_v33 = vsub.f32 %v861_v25, %v861_v25  ;;  %v1256_v34 = vand.u32 4294901760, %v147_v26 }
  0x1e   : > { %941 = vmatprep.subr.msk.mxu0 %vm1202_vm3, %v1126_v14  ;;  %v308_v35 = vsub.f32 %v860_v27, %v860_v27  ;;  %v1258_v36 = vand.u32 4294901760, %v150_v28  ;;  %v223_v38 = vand.u32 4294901760, %v1245_v30  ;;  %v233_v40 = vand.u32 4294901760, %v1250_v32 }
  0x1f   : > { %942 = vmatpush3.msk.msra.mxu0 %vm1202_vm3, %v1126_v14  ;;  %v289_v37 = vsub.f32 %v287_v21, %v1242_v29  ;;  %v296_v39 = vsub.f32 %v294_v23, %v1247_v31  ;;  %v302_v41 = vand.u32 4294901760, %v301_v33  ;;  %v1271_v42 = vsub.f32 %v147_v26, %v1256_v34 }
  0x20   : > { %943 = vmatprep.subr.msk.mxu0 %vm1206_vm4, %v1126_v14  ;;  %v1273_v43 = vand.u32 4294901760, %v308_v35  ;;  %v1276_v44 = vsub.f32 %v150_v28, %v1258_v36  ;;  %v224_v46 = vsub.f32 %v1245_v30, %v223_v38  ;;  %v234_v48 = vsub.f32 %v1250_v32, %v233_v40 }
  0x21   : > { %v290_v45 = vand.u32 4294901760, %v289_v37  ;;  %944 = vmatpush3.msk.msra.mxu0 %vm1206_vm4, %v1126_v14  ;;  %v297_v47 = vand.u32 4294901760, %v296_v39  ;;  %v303_v49 = vsub.f32 %v301_v33, %v302_v41  ;;  %v243_v50 = vand.u32 4294901760, %v1271_v42 }
  0x22   : > { %965 = vmatprep.subr.mxu0 %v287_v21  ;;  %v310_v51 = vsub.f32 %v308_v35, %v1273_v43  ;;  %v253_v52 = vand.u32 4294901760, %v1276_v44  ;;  %v225_v53 = vand.u32 4294901760, %v224_v46  ;;  %v235_v54 = vand.u32 4294901760, %v234_v48 }
  0x23   : > { %951 = vmatprep.subr.mxu1 %v290_v45  ;;  %v304_v55 = vand.u32 4294901760, %v303_v49  ;;  %v244_v56 = vsub.f32 %v1271_v42, %v243_v50 }
  0x24   : > { %952 = vmatpush3.msra.mxu1 %v290_v45  ;;  %v254_v57 = vsub.f32 %v1276_v44, %v253_v52  ;;  %945 = vmatprep.mubr.f32.mxu0 %v225_v53  ;;  %v311_v58 = vand.u32 4294901760, %v310_v51 }
  0x25   : > { %953 = vmatprep.subr.mxu1 %v297_v47  ;;  %946 = vmatmul.mubr.f32.vlgmr.msra.gmra.mxu0 %v235_v54  ;;  %v245_v59 = vand.u32 4294901760, %v244_v56 }
  0x26   : > { %954 = vmatpush3.msra.mxu1 %v297_v47  ;;  %966 = vmatpush3.msra.mxu0 %v287_v21  ;;  %v255_v60 = vand.u32 4294901760, %v254_v57 }
  0x27   : > { %955 = vmatprep.subr.mxu1 %v304_v55  ;;  %967 = vmatprep.subr.mxu0 %v294_v23 }
  0x28   : > { %956 = vmatpush3.msra.mxu1 %v304_v55  ;;  %948 = vmatprep.mubr.f32.mxu0 %v245_v59 }
  0x29   : > { %957 = vmatprep.subr.mxu1 %v311_v58  ;;  %968 = vmatpush3.msra.mxu0 %v294_v23 }
  0x2a   : > { %958 = vmatpush3.msra.mxu1 %v311_v58  ;;  %949 = vmatmul.mubr.f32.gmra.mxu0 %v255_v60 }
  0x2b   : > { %969 = vmatprep.subr.mxu0 %v301_v33  ;;  %960 = vmatmul.mubr.f32.vlgmr.msra.gmra.mxu1 %v1226_v24 }
  0x2c   : > { %970 = vmatpush3.msra.mxu0 %v301_v33  ;;  %979 = vmatprep.subr.msk.mxu1 %vm1194_vm1, %v1126_v14 }
  0x2d   : > { %971 = vmatprep.subr.mxu0 %v308_v35  ;;  %980 = vmatpush3.msk.msra.mxu1 %vm1194_vm1, %v1126_v14 }
  0x2e   : > { %972 = vmatpush3.msra.mxu0 %v308_v35  ;;  %973 = vmatprep.mubr.f32.mxu0 %v1245_v30 }
  0x2f   : > { %981 = vmatprep.subr.msk.mxu1 %vm1198_vm2, %v1126_v14  ;;  %962 = vmatprep.mubr.f32.mxu1 %v1256_v34 }
  0x30   : > { %974 = vmatmul.mubr.f32.vlgmr.msra.gmra.mxu0 %v1250_v32  ;;  %982 = vmatpush3.msk.msra.mxu1 %vm1198_vm2, %v1126_v14 }
  0x31   : > { %993 = vmatprep.subr.mxu0 %v1242_v29  ;;  %963 = vmatmul.mubr.f32.gmra.mxu1 %v1258_v36 }
  0x32   : > { %983 = vmatprep.subr.msk.mxu1 %vm1202_vm3, %v1126_v14  ;;  %994 = vmatpush3.msra.mxu0 %v1242_v29 }
  0x33   : > { %984 = vmatpush3.msk.msra.mxu1 %vm1202_vm3, %v1126_v14  ;;  %995 = vmatprep.subr.mxu0 %v1247_v31 }
  0x34   : > { %976 = vmatprep.mubr.f32.mxu0 %v1271_v42  ;;  %985 = vmatprep.subr.msk.mxu1 %vm1206_vm4, %v1126_v14 }
  0x35   : > { %996 = vmatpush3.msra.mxu0 %v1247_v31  ;;  %986 = vmatpush3.msk.msra.mxu1 %vm1206_vm4, %v1126_v14 }
  0x36   : > { %977 = vmatmul.mubr.f32.gmra.mxu0 %v1276_v44  ;;  %987 = vmatprep.mubr.f32.mxu1 %v223_v38 }
  0x37   : > { %997 = vmatprep.subr.mxu0 %v302_v41  ;;  %988 = vmatmul.mubr.f32.vlgmr.msra.gmra.mxu1 %v233_v40 }
  0x38   : > { %998 = vmatpush3.msra.mxu0 %v302_v41  ;;  %1007 = vmatprep.subr.msk.mxu1 %vm1194_vm1, %v1126_v14 }
  0x39   : > { %999 = vmatprep.subr.mxu0 %v1273_v43  ;;  %1008 = vmatpush3.msk.msra.mxu1 %vm1194_vm1, %v1126_v14 }
  0x3a   : > { %1000 = vmatpush3.msra.mxu0 %v1273_v43  ;;  %1001 = vmatprep.mubr.f32.mxu0 %v1224_v22 }
  0x3b   : > { %1009 = vmatprep.subr.msk.mxu1 %vm1198_vm2, %v1126_v14  ;;  %990 = vmatprep.mubr.f32.mxu1 %v243_v50 }
  0x3c   : > { %1002 = vmatmul.mubr.f32.vlgmr.msra.gmra.mxu0 %v1226_v24  ;;  %1010 = vmatpush3.msk.msra.mxu1 %vm1198_vm2, %v1126_v14 }
  0x3d   : > { %1004 = vmatprep.mubr.f32.mxu0 %v1256_v34  ;;  %991 = vmatmul.mubr.f32.gmra.mxu1 %v253_v52 }
  0x3e   : > { %1011 = vmatprep.subr.msk.mxu1 %vm1202_vm3, %v1126_v14  ;;  %1015 = vmatprep.mubr.f32.mxu1 %v1224_v22 }
  0x3f   : > { %1012 = vmatpush3.msk.msra.mxu1 %vm1202_vm3, %v1126_v14 }
  0x40   : > { %1013 = vmatprep.subr.msk.mxu1 %vm1206_vm4, %v1126_v14  ;;  %1005 = vmatmul.mubr.f32.gmra.mxu0 %v1258_v36 }
  0x41   : > { %1014 = vmatpush3.msk.msra.mxu1 %vm1206_vm4, %v1126_v14 }
  0x42   : > { %1016 = vmatmul.mubr.f32.vlgmr.msra.gmra.mxu1 %v1226_v24 }
  0x43   : > { %1018 = vmatprep.mubr.f32.mxu1 %v1256_v34 }
  0x46   : > { %1019 = vmatmul.mubr.f32.gmra.mxu1 %v1258_v36 }
  0xe5   : > { %v947_v61 = vpop.f32.mrf.mxu0 }
  0xe7   : > { %v227_v62 = vpop.f32.mrf.mxu0 }
  0xea   : > { %v950_v63 = vpop.f32.mrf.mxu0 }
  0xeb   : > { %v961_v0 = vpop.f32.mrf.mxu1 }
  0xec   : > { %v247_v1 = vpop.f32.mrf.mxu0  ;;  %v355_v8 = vadd.f32 %v961_v0, %v947_v61 }
  0xed   : > { %v348_v2 = vpop.f32.mrf.mxu1 }
  0xee   : > { %v349_v11 = vadd.f32 %v348_v2, %v227_v62 }
  0xf0   : > { %v975_v3 = vpop.f32.mrf.mxu0 }
  0xf1   : > { %v964_v4 = vpop.f32.mrf.mxu1  ;;  %v454_v13 = vadd.f32 %v975_v3, %v355_v8 }
  0xf2   : > { %v446_v5 = vpop.f32.mrf.mxu0  ;;  %v367_v14 = vadd.f32 %v964_v4, %v950_v63 }
  0xf3   : > { %v360_v6 = vpop.f32.mrf.mxu1  ;;  %v447_v15 = vadd.f32 %v446_v5, %v349_v11 }
  0xf4   : > { %v361_v17 = vadd.f32 %v360_v6, %v247_v1 }
  0xf6   : > { %v978_v7 = vpop.f32.mrf.mxu0 }
  0xf7   : > { %v989_v9 = vpop.f32.mrf.mxu1  ;;  %v468_v21 = vadd.f32 %v978_v7, %v367_v14 }
  0xf8   : > { %v460_v10 = vpop.f32.mrf.mxu0  ;;  %v553_v18 = vadd.f32 %v989_v9, %v454_v13 }
  0xf9   : > { %v544_v12 = vpop.f32.mrf.mxu1  ;;  %v461_v25 = vadd.f32 %v460_v10, %v361_v17 }
  0xfa   : > { %v545_v22 = vadd.f32 %v544_v12, %v447_v15 }
  0xfc   : > { %v1003_v16 = vpop.f32.mrf.mxu0 }
  0xfd   : > { %v992_v19 = vpop.f32.mrf.mxu1  ;;  %v658_v26 = vadd.f32 %v1003_v16, %v553_v18 }
  0xfe   : > { %v651_v20 = vpop.f32.mrf.mxu0  ;;  %v569_v27 = vadd.f32 %v992_v19, %v468_v21 }
  0xff   : > { %v560_v23 = vpop.f32.mrf.mxu1  ;;  %v652_v29 = vadd.f32 %v651_v20, %v545_v22 }
 0x100   : > { %v1006_v24 = vpop.f32.mrf.mxu0  ;;  %v561_v30 = vadd.f32 %v560_v23, %v461_v25 }
 0x101   : > { %v670_v34 = vadd.f32 %v1006_v24, %v569_v27 }
 0x102   : > { %v1017_v28 = vpop.f32.mrf.mxu1  ;;  %v663_v32 = vpop.f32.mrf.mxu0 }
 0x103   : > { %v751_v31 = vadd.f32 %v1017_v28, %v658_v26  ;;  %v664_v37 = vadd.f32 %v663_v32, %v561_v30 }
 0x104   : > { %v744_v33 = vpop.f32.mrf.mxu1 }
 0x105   : > { %879 = vst.msk [vmem:[%s1368_s25 + $0x18] sm:$0xff] %vm766_vm5, %v751_v31  ;;  %v745_v35 = vadd.f32 %v744_v33, %v652_v29 }
 0x106   : > { %v1020_v36 = vpop.f32.mrf.mxu1 }
 0x107   : > { %878 = vst.msk [vmem:[%s1368_s25 + $0x10] sm:$0xff] %vm766_vm5, %v745_v35  ;;  %v763_v38 = vadd.f32 %v1020_v36, %v670_v34 }
 0x108   : > { %v756_v39 = vpop.f32.mrf.mxu1 }
 0x109   : > { %881 = vst.msk [vmem:[%s1368_s25 + $0x28] sm:$0xff] %vm766_vm5, %v763_v38  ;;  %v757_v40 = vadd.f32 %v756_v39, %v664_v37 }
 0x10b   : > { %880 = vst.msk [vmem:[%s1368_s25 + $0x20] sm:$0xff] %vm766_vm5, %v757_v40 }
 0x10c   : > { %1077 = shalt.err (!%p1074_p3)
}
 0x10d   : > { %s1078_s11 = scalar_lea.hbm %s1391_s30, 1024  ;;  %s1082_s18 = scalar_lea.hbm %s1442_s1, 2048 }
 0x10e   : > { %p1079_p4 = scmp.ne.s32.totalorder %s1391_s30, %s1078_s11  ;;  %p1083_p9 = scmp.lt.s32.totalorder %s1391_s30, %s1442_s1 }
 0x10f   : > { %p1084_p10 = scmp.lt.s32.totalorder %s1082_s18, %s1078_s11 }
 0x110   : > { %p1080_p7 = pnand %p1079_p4, %p1179_p5 }
 0x111   : > { %p1085_p11 = por %p1084_p10, %p1083_p9 }
 0x112   : > { %p1081_p8 = pneg %p1080_p7 }
 0x114   : > { %p1086_p12 = pnand %p1085_p11, %p1081_p8 }
 0x116   : > { %1089 = shalt.err (!%p1086_p12)
}
 0x117   : > { %s1129_s21 = smov 128   ;;  %s1130_s22 = smov 8  }
 0x118   : > { %1021 = dma.vmem_to_hbm [thread:$0]  (%p1179_p5), %s1393_s27, 1024, %s1391_s30, %s1401_s2, %s1129_s21, %s1129_s21, %s1130_s22  }
 0x119 PF: > { %p1027_p13 = scmp.ge.s32.totalorder %s1124_s9, 2  ;;  %s806_s23 = sand.u32 1, %s1112_s6  }
 0x11a   : > { %s807_s24 = scalar_lea.sflag [#allocation3], %s806_s23 }
 0x11b   : > { %p1024_p0 = pnand %p1027_p13, %p1183_p6 }
 0x11d   : > { %p1025_p1 = pneg %p1024_p0 }
 0x11f   : > { %1107 = dma.done.wait (%p1025_p1), %s807_s24, 1024  }
 0x120   : > { %1109 = vsyncadd (%p1025_p1), %s807_s24, 4294966272  ;;  %p11_p2 = scmp.ge.s32.totalorder %s1166_s12, 4   ;;  %s1453_s6 = smov %s1116_s7 }
 0x121   : > { %s1454_s7 = smov %s1120_s8  ;;  %s1455_s8 = smov %s1177_s15 }
 0x122   : > { %s1456_s9 = smov %s1166_s12  ;;  %13 = sbr.rel (!%p11_p2) target bundleno = 3 (0x3), region = 61 }
 0x127   :  { %812 = vsyncpa [#allocation3], 1 }
 0x128   :  { %814 = vsyncpa [#allocation3 + $0x1], 1 }

</bundles_post_ra>
